<compile_context>
chip_gen: v7x
topology: tpu7x:2x2x1
jax: 0.10.0
libtpu: 0.0.40
codegen_flags: <defaults>
</compile_context>

<pallas_src>
import functools

import jax
import jax.numpy as jnp
from jax.experimental import pallas as pl
from jax.experimental.pallas import tpu as pltpu


_LANES = 128
_SUBLANES = 8


def _round_up(x, m):
    return ((x + m - 1) // m) * m


# ---------------------------------------------------------------------------
# Fused multi-layer attention (misdirection) loss: streaming multiply + reduce.
# ---------------------------------------------------------------------------
def _make_attention_kernel(num_layers, bias):
    def kernel(*refs):
        sattn_refs = refs[:num_layers]
        pattn_ref = refs[num_layers]
        out_ref = refs[num_layers + 1]

        @pl.when(pl.program_id(1) == 0)
        def _():
            out_ref[...] = jnp.zeros_like(out_ref)

        # Penalty factor pf = -pattn + 1 + bias, computed once per tile and
        # shared by all layers (pattn is read from HBM only once per tile).
        pf = (1.0 + bias) - pattn_ref[...].astype(jnp.float32)      # (tm, 128)
        tm = pf.shape[0]
        for l in range(num_layers):                                 # static unroll
            s = sattn_refs[l][...].astype(jnp.float32)
            # Pure-VPU partial reduce: fold (tm, 128) -> (8, 128) vreg slab.
            part = (s * pf).reshape(tm // _SUBLANES, _SUBLANES, _LANES).sum(axis=0)
            out_ref[0, l * _SUBLANES:(l + 1) * _SUBLANES, :] += part

    return kernel


def _attention_raw_sums(sattn_list, pattn, bias, *, row_tile=1024, num_splits=2,
                        vmem_budget_bytes=8 * 1024 * 1024):
    """Returns an (L,) f32 array with sum(sattn_l * (-pattn + 1 + bias)) per layer."""
    num_layers = len(sattn_list)
    for s in sattn_list:
        assert s.shape == pattn.shape, "sattn/pattn shape mismatch"

    total = 1
    for d in pattn.shape:
        total *= d

    itemsize = max(jnp.dtype(pattn.dtype).itemsize,
                   max(jnp.dtype(s.dtype).itemsize for s in sattn_list))
    # Double-buffered (num_layers + 1) input tiles must fit the VMEM budget.
    tm_cap = vmem_budget_bytes // (2 * (num_layers + 1) * _LANES * itemsize)
    tm_cap = max(_SUBLANES, (tm_cap // _SUBLANES) * _SUBLANES)

    rows = pl.cdiv(total, _LANES)
    rows_per_split = pl.cdiv(rows, num_splits)
    tm = max(_SUBLANES,
             min(int(row_tile), tm_cap, _round_up(rows_per_split, _SUBLANES)))
    tm = _round_up(tm, _SUBLANES)
    rows_per_split = _round_up(rows_per_split, tm)
    rows_padded = rows_per_split * num_splits
    total_padded = rows_padded * _LANES
    inner_blocks = rows_per_split // tm

    def to_slab(x):
        flat = x.reshape(-1)
        if total_padded != total:
            # Zero-padded sattn rows contribute exactly 0 regardless of pattn.
            flat = jnp.pad(flat, (0, total_padded - total))
        return flat.reshape(rows_padded, _LANES)

    slabs = [to_slab(s) for s in sattn_list] + [to_slab(pattn)]

    in_map = lambda c, i: (c * inner_blocks + i, 0)
    kernel = _make_attention_kernel(num_layers, float(bias))

    partials = pl.pallas_call(
        kernel,
        out_shape=jax.ShapeDtypeStruct(
            (num_splits, num_layers * _SUBLANES, _LANES), jnp.float32),
        grid_spec=pltpu.PrefetchScalarGridSpec(
            num_scalar_prefetch=0,
            grid=(num_splits, inner_blocks),
            in_specs=[pl.BlockSpec((tm, _LANES), in_map)] * (num_layers + 1),
            out_specs=pl.BlockSpec((1, num_layers * _SUBLANES, _LANES),
                                   lambda c, i: (c, 0, 0)),
        ),
        compiler_params=pltpu.CompilerParams(
            # outer axis: split across TensorCores (2x on v7x, no-op on v5e/v6e);
            # inner axis: sequential streaming reduction into a resident block.
            dimension_semantics=("parallel", "arbitrary"),
        ),
    )(*slabs)

    # Single tiny cross-lane reduce done on the JAX side.
    return jnp.sum(
        partials.reshape(num_splits, num_layers, _SUBLANES, _LANES), axis=(0, 2, 3))


def attention_loss(sattn, pattn, bias=-0.17, *, row_tile=1024, num_splits=2):
    """Single-layer SAM attention (misdirection) loss: log(clamp(sum(sattn*pf)))."""
    raw = _attention_raw_sums([sattn], pattn, bias,
                              row_tile=row_tile, num_splits=num_splits)[0]
    raw = jnp.where(raw <= 1.0, 1.0, raw)        # matches torch `<= 1 -> 1`
    return jnp.log(raw)


# ---------------------------------------------------------------------------
# Cross-entropy loss (mean reduction, matching nn.CrossEntropyLoss defaults).
# ---------------------------------------------------------------------------
def _cross_entropy_kernel(logits_ref, labels_ref, out_ref):
    x = logits_ref[...].astype(jnp.float32)                    # (B, C)
    b, c = x.shape
    m = jnp.max(x, axis=-1, keepdims=True)
    lse = jnp.log(jnp.sum(jnp.exp(x - m), axis=-1, keepdims=True)) + m   # (B, 1)
    cls = jax.lax.broadcasted_iota(jnp.int32, (b, c), 1)
    onehot = cls == labels_ref[...]                            # (B, C) via (B,1) bcast
    tgt = jnp.sum(jnp.where(onehot, x, 0.0), axis=-1, keepdims=True)     # (B, 1)
    out_ref[...] = jnp.mean(lse - tgt, keepdims=True)          # (1, 1)


def cross_entropy_loss(logits, labels):
    labels2 = labels.reshape(-1, 1).astype(jnp.int32)
    out = pl.pallas_call(
        _cross_entropy_kernel,
        out_shape=jax.ShapeDtypeStruct((1, 1), jnp.float32),
    )(logits, labels2)
    return out[0, 0]


# ---------------------------------------------------------------------------
# CriticLoss forward.
# ---------------------------------------------------------------------------
def critic_loss(preds, label, *, layers=(0, 1, 2, 3, 4, 5), bias=-0.17,
                lambdas=(0.002, 0.002, 0.002, 0.002, 0.002, 0.002),
                row_tile=1024, num_splits=2):
    """preds = (logits, [per-layer sattn], <unused>, pattn) — mirrors the torch module."""
    logits = preds[0]
    sattn_layers = preds[1]
    pattn = preds[3]

    lc = cross_entropy_loss(logits, label)

    sattn_sel = [sattn_layers[layer] for layer in layers]
    raw = _attention_raw_sums(sattn_sel, pattn, bias,
                              row_tile=row_tile, num_splits=num_splits)   # (L,)
    raw = jnp.where(raw <= 1.0, 1.0, raw)
    lam = jnp.asarray(lambdas[:len(layers)], jnp.float32)
    latt = jnp.sum(lam * jnp.log(raw))
    return lc + latt


# ---------------------------------------------------------------------------
# Pure-JAX references for verification.
# ---------------------------------------------------------------------------
def _reference_attention_loss(sattn, pattn, bias=-0.17):
    pf = -pattn.astype(jnp.float32) + 1.0 + bias
    att = jnp.sum(sattn.astype(jnp.float32) * pf)
    att = jnp.where(att <= 1.0, 1.0, att)
    return jnp.log(att)


def _reference_critic_loss(preds, label, layers, bias, lambdas):
    logits, sattn_layers, _, pattn = preds
    x = logits.astype(jnp.float32)
    lse = jax.nn.logsumexp(x, axis=-1)
    tgt = jnp.take_along_axis(x, label[:, None], axis=-1)[:, 0]
    ce = jnp.mean(lse - tgt)
    latt = 0.0
    for i, layer in enumerate(layers):
        latt = latt + lambdas[i] * _reference_attention_loss(
            sattn_layers[layer], pattn, bias=bias)
    return ce + latt


if __name__ == "__main__":
    key = jax.random.PRNGKey(0)
    keys = jax.random.split(key, 11)

    # Small shapes consistent with the module: batch=2, heads=4, seq=16, classes=10, 6 layers.
    B, H, N, C, L = 2, 4, 16, 10, 6
    layers = (0, 1, 2, 3, 4, 5)
    lambdas = (0.002,) * 6
    bias = -0.17

    logits = jax.random.normal(keys[0], (B, C), dtype=jnp.float32)
    label = jax.random.randint(keys[1], (B,), 0, C)
    sattn_layers = [
        jax.nn.softmax(jax.random.normal(keys[2 + i], (B, H, N, N), dtype=jnp.float32), axis=-1)
        for i in range(L)
    ]
    pattn = jax.random.uniform(keys[8], (B, H, N, N), dtype=jnp.float32)
    preds = (logits, sattn_layers, None, pattn)

    loss = critic_loss(preds, label, layers=layers, bias=bias, lambdas=lambdas)
    loss = jax.block_until_ready(loss)
    ref = _reference_critic_loss(preds, label, layers, bias, lambdas)
    assert jnp.allclose(loss, ref, rtol=1e-4, atol=1e-5), (loss, ref)

    # Extra check: ragged element count (padding path) + multiple inner grid steps.
    s_extra = jax.random.uniform(keys[9], (3, 5, 24, 24), dtype=jnp.float32)
    p_extra = jax.random.uniform(keys[10], (3, 5, 24, 24), dtype=jnp.float32)
    latt = jax.block_until_ready(attention_loss(s_extra, p_extra, bias=bias, row_tile=8))
    latt_ref = _reference_attention_loss(s_extra, p_extra, bias=bias)
    assert jnp.allclose(latt, latt_ref, rtol=1e-4, atol=1e-5), (latt, latt_ref)

    print("KERNEL_OK")
</pallas_src>

<mosaic_0001>
module attributes {stable_mosaic.version = 11 : i64} {
  func.func @_cross_entropy_kernel(%arg0: memref<2x10xf32, #tpu.memory_space<vmem>>, %arg1: memref<2x1xi32, #tpu.memory_space<vmem>>, %arg2: memref<1x1xf32, #tpu.memory_space<vmem>>) attributes {dimension_semantics = [], scalar_prefetch = 0 : i64, scratch_operands = 0 : i64, tpu.core_type = #tpu.core_type<tc>} {
    %c0 = arith.constant 0 : index
    %c0_0 = arith.constant 0 : index
    %0 = vector.load %arg0[%c0, %c0_0] : memref<2x10xf32, #tpu.memory_space<vmem>>, vector<2x10xf32>
    %cst = arith.constant dense<0xFF800000> : vector<2xf32>
    %1 = vector.multi_reduction <maximumf>, %0, %cst [1] : vector<2x10xf32> to vector<2xf32>
    %2 = vector.shape_cast %1 : vector<2xf32> to vector<2x1xf32>
    %3 = vector.broadcast %2 : vector<2x1xf32> to vector<2x10xf32>
    %4 = arith.subf %0, %3 : vector<2x10xf32>
    %5 = math.exp %4 : vector<2x10xf32>
    %cst_1 = arith.constant dense<0.000000e+00> : vector<2xf32>
    %6 = vector.multi_reduction <add>, %5, %cst_1 [1] : vector<2x10xf32> to vector<2xf32>
    %7 = vector.shape_cast %6 : vector<2xf32> to vector<2x1xf32>
    %8 = math.log %7 : vector<2x1xf32>
    %9 = arith.addf %8, %2 : vector<2x1xf32>
    %10 = tpu.iota {dimensions = array<i32: 1>} : vector<2x10xi32>
    %c0_2 = arith.constant 0 : index
    %c0_3 = arith.constant 0 : index
    %11 = vector.load %arg1[%c0_2, %c0_3] : memref<2x1xi32, #tpu.memory_space<vmem>>, vector<2x1xi32>
    %12 = vector.broadcast %11 : vector<2x1xi32> to vector<2x10xi32>
    %13 = arith.cmpi eq, %10, %12 : vector<2x10xi32>
    %cst_4 = arith.constant 0.000000e+00 : f32
    %14 = vector.broadcast %cst_4 : f32 to vector<2x10xf32>
    %15 = arith.select %13, %0, %14 : vector<2x10xi1>, vector<2x10xf32>
    %cst_5 = arith.constant dense<0.000000e+00> : vector<2xf32>
    %16 = vector.multi_reduction <add>, %15, %cst_5 [1] : vector<2x10xf32> to vector<2xf32>
    %17 = vector.shape_cast %16 : vector<2xf32> to vector<2x1xf32>
    %18 = arith.subf %9, %17 : vector<2x1xf32>
    %19 = vector.shape_cast %18 : vector<2x1xf32> to vector<1x2x1xf32>
    %cst_6 = arith.constant dense<0.000000e+00> : vector<1xf32>
    %20 = vector.multi_reduction <add>, %19, %cst_6 [1, 2] : vector<1x2x1xf32> to vector<1xf32>
    %21 = vector.shape_cast %20 : vector<1xf32> to vector<1x1x1xf32>
    %22 = vector.extract %21[0, 0, 0] : f32 from vector<1x1x1xf32>
    %23 = vector.broadcast %22 : f32 to vector<1x1xf32>
    %cst_7 = arith.constant 2.000000e+00 : f32
    %24 = vector.broadcast %cst_7 : f32 to vector<1x1xf32>
    %25 = arith.divf %23, %24 : vector<1x1xf32>
    %c0_8 = arith.constant 0 : index
    %c0_9 = arith.constant 0 : index
    %26 = vector.load %arg2[%c0_8, %c0_9] : memref<1x1xf32, #tpu.memory_space<vmem>>, vector<1x1xf32>
    tpu.vector_store %arg2[%c0_8, %c0_9], %25 {strides = array<i32>} : memref<1x1xf32, #tpu.memory_space<vmem>>, vector<1x1xf32>,
    return
  }
}

</mosaic_0001>

<bundles_post_ra>
// kernel: tpu_custom_call.1
= control target key start
LH: loop header
LB: loop body
LE: loop exit
PB: predicated region body
PF: predicated region fallthrough
CT: control target
= control target key end

     0   :  { %vm13_vm0 = vcmask 74752   ;;  %v101_v2 = vmov 0   ;;  %s139_s0 = inlined_call_operand.vmem [shape: f32[2,10], index: 0, kind: input, shape index: {}]   ;;  %s140_s1 = inlined_call_operand.vmem [shape: s32[2,1], index: 1, kind: input, shape index: {}]   ;;  %s141_s2 = inlined_call_operand.hbm [shape: f32[1,1], index: 2, kind: output, shape index: {}]  }
   0x1   :  { %v12_v0 = vld [vmem:[%s139_s0] sm:$0x3]  ;;  %72 = vset.pattern.permute.xlu0 %v101_v2 }
   0x2   :  { %v14_v1 = vsel %vm13_vm0, %v12_v0, -inf }
   0x3   :  { %7 = vsyncpa [#allocation3], 0  ;;  %15 = vmax.xlane.f32.xlu0 %v14_v1  ;;  %v28_v3 = vld [vmem:[%s140_s1] sm:$0x3]  ;;  %v26_v7 = vlaneseq  ;;  %vm38_vm2 = vcmask 1024   ;;  %s102_s0 = smov [#allocation2]  }
   0x4   :  { %s60_s1 = sshll.u32 %s102_s0, 4  ;;  %vm52_vm3 = vcmask 0   ;;  %s61_s1 = int_to_ptr.vmem [resolvable:$true] %s60_s1 }
   0x5   :  { %v27_v8 = vand.u32 127, %v26_v7  ;;  %s77_s14 = scalar_lea.vmem %s61_s1, 16  ;;  %s81_s15 = scalar_lea.vmem %s61_s1, 32 }
   0x6   :  { %p78_p0 = scmp.ne.s32.totalorder %s61_s1, %s77_s14  ;;  %p82_p1 = scmp.lt.s32.totalorder %s61_s1, %s61_s1 }
   0x7   :  { %p83_p2 = scmp.lt.s32.totalorder %s81_s15, %s77_s14 }
   0x9   :  { %p84_p3 = por %p83_p2, %p82_p1 }
   0xb   :  { %p85_p4 = pnand %p84_p3, %p78_p0 }
  0x19   :  { %30 = vperm.xlu0 %72, %v28_v3  }
  0x90   :  { %v16_v4 = vpop.xlane.xlu0 %15 }
  0x91   :  { %v17_v5 = vsub.f32 %v12_v0, %v16_v4 }
  0x93   :  { %v18_v6 = vmul.f32 1.442695, %v17_v5 }
  0x95   :  { %73 = vpow2.f32 %v18_v6 }
  0x98   :  { %v31_v9 = vpop.permute.xlu0 %30 }
  0x99   :  { %vm32_vm1 = vcmp.eq.s32.totalorder %v27_v8, %v31_v9 }
  0x9a   :  { %v33_v11 = vsel %vm32_vm1, %v12_v0, 0.0 }
  0x9b   :  { %v34_v13 = vsel %vm13_vm0, %v33_v11, 0.0 }
  0x9f   :  { %v74_v10 = vpop.eup %73 }
  0xa0   :  { %v20_v12 = vsel %vm13_vm0, %v74_v10, 0.0 }
  0xa1   :  { %21 = vadd.xlane.f32.xlu1 %v20_v12 }
  0xa5   :  { %35 = vadd.xlane.f32.xlu1 %v34_v13 }
 0x12e   :  { %v22_v14 = vpop.xlane.xlu1 %21 }
 0x12f   :  { %75 = vlog2.f32 %v22_v14 }
 0x132   :  { %v36_v17 = vpop.xlane.xlu1 %35 }
 0x139   :  { %v76_v15 = vpop.eup %75 }
 0x13a   :  { %v24_v16 = vmul.f32 0.6931472, %v76_v15 }
 0x13c   :  { %v25_v18 = vadd.f32 %v24_v16, %v16_v4 }
 0x13e   :  { %v37_v19 = vsub.f32 %v25_v18, %v36_v17 }
 0x140   :  { %v39_v20 = vsel %vm38_vm2, %v37_v19, 0.0 }
 0x141   :  { %40 = vadd.xlane.f32.xlu1 %v39_v20 }
 0x1ce   :  { %v41_v21 = vpop.xlane.xlu1 %40 }
 0x1cf   :  { %v42_v22 = vrot.slane %v41_v21, 4 }
 0x1d1   :  { %v43_v23 = vadd.f32 %v42_v22, %v41_v21 }
 0x1d3   :  { %v44_v24 = vrot.slane %v43_v23, 2 }
 0x1d5   :  { %v45_v25 = vadd.f32 %v44_v24, %v43_v23 }
 0x1d7   :  { %v46_v26 = vrot.slane %v45_v25, 1 }
 0x1d9   :  { %v47_v27 = vadd.f32 %v46_v26, %v45_v25 }
 0x1db   :  { %68 = vpush %v47_v27 }
 0x20c   :  { %s69_s13 = spop %68 }
 0x20d   :  { %v49_v28 = vstv %s69_s13 }
 0x20e   :  { %v51_v29 = vmul.f32 0.5, %v49_v28 }
 0x210   :  { %53 = vst.msk [vmem:[#allocation2] sm:$0x1] %vm52_vm3, %v51_v29 }
 0x211   :  { %88 = shalt.err (!%p85_p4)
}
 0x212   :  { %s89_s18 = scalar_lea.hbm %s141_s2, 16 }
 0x213   :  { %p90_p5 = scmp.ne.s32.totalorder %s141_s2, %s89_s18  ;;  %p93_p6 = scmp.lt.u32.totalorder %s89_s18, %s141_s2 }
 0x215   :  { %p95_p7 = pnand %p93_p6, %p90_p5 }
 0x217   :  { %98 = shalt.err (!%p95_p7)
}
 0x218   :  { %63 = dma.vmem_to_hbm [thread:$0]  %s61_s1, 16, %s141_s2, [#allocation3]  }
 0x219   :  { %99 = dma.done.wait [#allocation3], 16  }
 0x21a   :  { %100 = vsyncadd [#allocation3], 4294967280 }
 0x21b   :  { %67 = vsyncpa [#allocation3], 1 }

</bundles_post_ra>
